<compile_context>
chip_gen: v7x
topology: tpu7x:2x2x1
jax: 0.10.0
libtpu: 0.0.40
codegen_flags: <defaults>
</compile_context>

<pallas_src>
import functools
import math

import jax
import jax.numpy as jnp
from jax.experimental import pallas as pl
from jax.experimental.pallas import tpu as pltpu


def fused_mbconv_kernel(x_ref, w1_ref, b1_ref, w2_ref, b2_ref, o_ref, *,
                        kdim, wp):
    """One (batch, row-tile) grid step.

    x_ref : (Cin, SLAB)       bf16  zero-padded row slab, flattened row-major,
                                    with (kdim//2) guard elements on each end.
    w1_ref: (Cexp, K*K*Cin)   bf16  3x3 weights, BN scale1 pre-folded; columns
                                    ordered (kh, kw, cin).
    b1_ref: (Cexp, 1)         f32   BN bias1.
    w2_ref: (Cout, Cexp)      bf16  1x1 weights, BN scale2 pre-folded.
    b2_ref: (Cout, 1)         f32   BN bias2.
    o_ref : (Cout, TH*Wp)     f32   this tile's output rows (padded width).
    """
    twp = o_ref.shape[-1]

    x = x_ref[...]                                    # (Cin, SLAB), bf16

    # --- 3x3 conv as ONE deep-contraction MXU dot: stack the 9 statically
    #     lane-shifted views along the contraction axis. ---
    views = []
    for kk in range(kdim * kdim):
        kh, kw = kk // kdim, kk % kdim
        start = kh * wp + kw                          # static offset
        views.append(x[:, start:start + twp])         # (Cin, TWP)
    rhs = jnp.concatenate(views, axis=0)              # (K*K*Cin, TWP), bf16
    acc = jnp.dot(w1_ref[...], rhs,
                  preferred_element_type=jnp.float32)  # (Cexp, TWP), f32

    # --- BatchNorm bias (scale folded into w1) + SiLU, in f32 ---
    h = acc + b1_ref[...]
    h = h * jax.nn.sigmoid(h)

    # --- 1x1 conv: bf16 x bf16 operands, f32 accumulation; + BN bias2 ---
    y = jnp.dot(w2_ref[...], h.astype(jnp.bfloat16),
                preferred_element_type=jnp.float32)    # (Cout, TWP)
    y = y + b2_ref[...]

    # --- residual (use_res_connect): the centre-tap view is the unshifted
    #     input rows of this tile (Cin == Cout).  Adds the bf16-stored input
    #     (documented deviation from exact f32 module semantics). ---
    # TODO(synk): StochasticDepth('row') with prob>0 in training mode is not
    # modeled; eval-mode identity semantics are used here.
    ctr = (kdim // 2) * wp + (kdim // 2)
    y = y + x[:, ctr:ctr + twp].astype(jnp.float32)

    o_ref[...] = y.astype(o_ref.dtype)


def _choose_row_tile(H, W, Cin, Cout, pad, vmem_budget):
    """Largest row tile TH (divisor of H) whose per-step double-buffered
    footprint fits `vmem_budget` (re-derived for v7x's 64 MiB VMEM)."""
    chosen = None
    for th in range(H, 0, -1):
        if H % th:
            continue
        lane_mult = 128 // math.gcd(th, 128)          # TH*Wp % 128 == 0 always
        wp = -(-(W + 2 * pad) // lane_mult) * lane_mult
        slab = (th + 2 * pad) * wp + 2 * pad
        footprint = (2 * Cin * slab * 2               # 2-buffered bf16 slab
                     + 2 * Cout * th * wp * 4)        # 2-buffered f32 output
        chosen = (th, wp)
        if footprint <= vmem_budget:
            break
    return chosen


@jax.jit
def fused_mbconv(x_nchw, w1_hwio, scale1, bias1, w2_mat, scale2, bias2):
    """x_nchw: (N, Cin, H, W) float32.  Returns (N, Cout, H, W) float32."""
    N, Cin, H, W = x_nchw.shape
    K = w1_hwio.shape[0]
    Cexp = w1_hwio.shape[-1]
    Cout = w2_mat.shape[-1]
    pad = (K - 1) // 2                 # same-size conv padding (K odd)

    # Row tiling: prefer TH = H (one step per image, fewer/bigger grid steps);
    # shrink only if the per-step footprint would blow the VMEM budget.
    TH, Wp = _choose_row_tile(H, W, Cin, Cout, pad, vmem_budget=24 << 20)
    R = H // TH
    TWP = TH * Wp                      # multiple of 128 -> dense stores
    SLAB = (TH + 2 * pad) * Wp + 2 * pad

    # ---- glue: zero-pad once; slabs are (possibly overlapping) row windows.
    #      With R == 1 (toy + retiled case) there is no halo duplication. ----
    xpad = jnp.pad(x_nchw, ((0, 0), (0, 0), (pad, pad), (pad, Wp - W - pad)))
    if R == 1:
        slabs = xpad[:, None]                                  # (N,1,Cin,H+2p,Wp)
    else:
        slabs = jnp.stack([xpad[:, :, r * TH:r * TH + TH + 2 * pad, :]
                           for r in range(R)], axis=1)         # (N,R,Cin,TH+2p,Wp)
    slabs = slabs.reshape(N, R, Cin, (TH + 2 * pad) * Wp)
    x_tiles = jnp.pad(slabs, ((0, 0), (0, 0), (0, 0), (pad, pad)))
    x_tiles = x_tiles.astype(jnp.bfloat16)                     # (N, R, Cin, SLAB)

    # ---- weights: fold BN scales; flatten the 3x3 taps into the contraction ----
    w1_flat = jnp.transpose(w1_hwio * scale1, (3, 0, 1, 2))    # (Cexp, K, K, Cin)
    w1_flat = w1_flat.reshape(Cexp, K * K * Cin).astype(jnp.bfloat16)
    w2_t = (w2_mat * scale2).T.astype(jnp.bfloat16)            # (Cout, Cexp)
    b1_col = bias1.reshape(Cexp, 1).astype(jnp.float32)
    b2_col = bias2.reshape(Cout, 1).astype(jnp.float32)

    kernel = functools.partial(fused_mbconv_kernel, kdim=K, wp=Wp)

    out = pl.pallas_call(
        kernel,
        out_shape=jax.ShapeDtypeStruct((N, R, Cout, TWP), jnp.float32),
        grid_spec=pltpu.PrefetchScalarGridSpec(
            num_scalar_prefetch=0,
            grid=(N, R),
            in_specs=[
                pl.BlockSpec((pl.Squeezed(), pl.Squeezed(), Cin, SLAB),
                             lambda n, r: (n, r, 0, 0)),
                pl.BlockSpec((Cexp, K * K * Cin), lambda n, r: (0, 0)),
                pl.BlockSpec((Cexp, 1), lambda n, r: (0, 0)),
                pl.BlockSpec((Cout, Cexp), lambda n, r: (0, 0)),
                pl.BlockSpec((Cout, 1), lambda n, r: (0, 0)),
            ],
            out_specs=pl.BlockSpec((pl.Squeezed(), pl.Squeezed(), Cout, TWP),
                                   lambda n, r: (n, r, 0, 0)),
        ),
        compiler_params=pltpu.CompilerParams(
            dimension_semantics=("parallel", "parallel"),
            vmem_limit_bytes=32 * 1024 * 1024),
    )(x_tiles, w1_flat, b1_col, w2_t, b2_col)

    # ---- glue: (N, R, Cout, TH*Wp) -> NCHW, drop padded columns ----
    out = out.reshape(N, R, Cout, TH, Wp)
    if R == 1:
        out = out.reshape(N, Cout, H, Wp)             # no transpose / HBM pass
    else:
        out = jnp.transpose(out, (0, 2, 1, 3, 4)).reshape(N, Cout, H, Wp)
    return out[:, :, :, pad:pad + W]


def ref_forward(x_nchw, w1_hwio, scale1, bias1, w2_mat, scale2, bias2,
                h_dtype=jnp.float32):
    """Pure-JAX reference (eval-mode BN, SiLU, residual).  `h_dtype` optionally
    quantizes the intermediate activation like the kernel's bf16 1x1 operand."""
    K = w1_hwio.shape[0]
    pad = (K - 1) // 2
    x = jnp.transpose(x_nchw, (0, 2, 3, 1))
    y = jax.lax.conv_general_dilated(
        x, w1_hwio, window_strides=(1, 1), padding=((pad, pad), (pad, pad)),
        dimension_numbers=("NHWC", "HWIO", "NHWC"),
        precision=jax.lax.Precision.HIGHEST)
    y = y * scale1 + bias1
    y = y * jax.nn.sigmoid(y)
    y = y.astype(h_dtype).astype(jnp.float32)
    y = jnp.einsum("nhwc,cd->nhwd", y, w2_mat,
                   precision=jax.lax.Precision.HIGHEST)
    y = y * scale2 + bias2
    y = y + x
    return jnp.transpose(y, (0, 3, 1, 2))


if __name__ == "__main__":
    # FusedMBConvConfig(expand_ratio=4, kernel=3, stride=1,
    #                   input_channels=4, out_channels=4, num_layers=1)
    N, Cin, H, W = 2, 4, 16, 16
    K, Cexp, Cout = 3, 16, 4
    eps = 1e-5

    key = jax.random.PRNGKey(0)
    ks = jax.random.split(key, 11)

    x = jax.random.normal(ks[0], (N, Cin, H, W), jnp.float32)

    # Conv weights (HWIO layout; PyTorch OIHW weight == transpose of this).
    w1_hwio = jax.random.normal(ks[1], (K, K, Cin, Cexp), jnp.float32) * 0.1
    w2_mat = jax.random.normal(ks[2], (Cexp, Cout), jnp.float32) * 0.1

    # BatchNorm params / running stats (eval mode).
    gamma1 = jax.random.uniform(ks[3], (Cexp,), jnp.float32, 0.5, 1.5)
    beta1 = jax.random.normal(ks[4], (Cexp,), jnp.float32) * 0.1
    mean1 = jax.random.normal(ks[5], (Cexp,), jnp.float32) * 0.1
    var1 = jax.random.uniform(ks[6], (Cexp,), jnp.float32, 0.5, 1.5)
    gamma2 = jax.random.uniform(ks[7], (Cout,), jnp.float32, 0.5, 1.5)
    beta2 = jax.random.normal(ks[8], (Cout,), jnp.float32) * 0.1
    mean2 = jax.random.normal(ks[9], (Cout,), jnp.float32) * 0.1
    var2 = jax.random.uniform(ks[10], (Cout,), jnp.float32, 0.5, 1.5)

    # Fold BN into per-channel scale/bias (inference semantics).
    scale1 = gamma1 / jnp.sqrt(var1 + eps)
    bias1 = beta1 - mean1 * scale1
    scale2 = gamma2 / jnp.sqrt(var2 + eps)
    bias2 = beta2 - mean2 * scale2

    out = fused_mbconv(x, w1_hwio, scale1, bias1, w2_mat, scale2, bias2)
    out = jax.block_until_ready(out)
    assert out.shape == (N, Cout, H, W)

    # Tight check: reference with the SAME bf16 quantization of the streamed
    # input, scale-folded weights, and 1x1 input activation that the kernel
    # uses (isolates kernel bugs from bf16 storage / cast error).
    f32 = jnp.float32
    xq = x.astype(jnp.bfloat16).astype(f32)
    w1q = (w1_hwio * scale1).astype(jnp.bfloat16).astype(f32)
    w2q = (w2_mat * scale2).astype(jnp.bfloat16).astype(f32)
    ref_q = ref_forward(xq, w1q, jnp.ones((Cexp,), f32), bias1,
                        w2q, jnp.ones((Cout,), f32), bias2,
                        h_dtype=jnp.bfloat16)
    assert jnp.allclose(out, ref_q, rtol=5e-3, atol=5e-3), "mismatch vs bf16 ref"

    # Loose check vs the pure-f32 module semantics (difference == bf16 storage
    # of the streamed operands/weights/intermediate).
    ref = ref_forward(x, w1_hwio, scale1, bias1, w2_mat, scale2, bias2)
    assert jnp.allclose(out, ref, rtol=1e-1, atol=1e-1), "mismatch vs f32 ref"

    print("KERNEL_OK")
</pallas_src>

<mosaic_0001>
module attributes {stable_mosaic.version = 11 : i64} {
  func.func @fused_mbconv_kernel(%arg0: i32, %arg1: i32, %arg2: memref<1x1x4x434xbf16, #tpu.memory_space<vmem>>, %arg3: memref<16x36xbf16, #tpu.memory_space<vmem>>, %arg4: memref<16x1xf32, #tpu.memory_space<vmem>>, %arg5: memref<4x16xbf16, #tpu.memory_space<vmem>>, %arg6: memref<4x1xf32, #tpu.memory_space<vmem>>, %arg7: memref<1x1x4x384xf32, #tpu.memory_space<vmem>>) attributes {dimension_semantics = [#tpu.dimension_semantics<parallel>, #tpu.dimension_semantics<parallel>], iteration_bounds = array<i64: 2, 1>, scalar_prefetch = 0 : i64, scratch_operands = 0 : i64, tpu.core_type = #tpu.core_type<tc>, window_params = [{transform_indices = @transform_0, window_bounds = array<i64: 1, 1, 4, 434>}, {pipeline_mode = #tpu.pipeline_mode<synchronous>, transform_indices = @transform_1, window_bounds = array<i64: 16, 36>}, {pipeline_mode = #tpu.pipeline_mode<synchronous>, transform_indices = @transform_2, window_bounds = array<i64: 16, 1>}, {pipeline_mode = #tpu.pipeline_mode<synchronous>, transform_indices = @transform_3, window_bounds = array<i64: 4, 16>}, {pipeline_mode = #tpu.pipeline_mode<synchronous>, transform_indices = @transform_4, window_bounds = array<i64: 4, 1>}, {transform_indices = @transform_5, window_bounds = array<i64: 1, 1, 4, 384>}]} {
    %c0 = arith.constant 0 : index
    %c0_0 = arith.constant 0 : index
    %c0_1 = arith.constant 0 : index
    %c0_2 = arith.constant 0 : index
    %0 = vector.load %arg2[%c0, %c0_0, %c0_1, %c0_2] : memref<1x1x4x434xbf16, #tpu.memory_space<vmem>>, vector<1x1x4x434xbf16>
    %1 = vector.shape_cast %0 : vector<1x1x4x434xbf16> to vector<4x434xbf16>
    %2 = vector.extract_strided_slice %1 {offsets = [0, 0], sizes = [4, 384], strides = [1, 1]} : vector<4x434xbf16> to vector<4x384xbf16>
    %3 = vector.extract_strided_slice %1 {offsets = [0, 1], sizes = [4, 384], strides = [1, 1]} : vector<4x434xbf16> to vector<4x384xbf16>
    %4 = vector.extract_strided_slice %1 {offsets = [0, 2], sizes = [4, 384], strides = [1, 1]} : vector<4x434xbf16> to vector<4x384xbf16>
    %5 = vector.extract_strided_slice %1 {offsets = [0, 24], sizes = [4, 384], strides = [1, 1]} : vector<4x434xbf16> to vector<4x384xbf16>
    %6 = vector.extract_strided_slice %1 {offsets = [0, 25], sizes = [4, 384], strides = [1, 1]} : vector<4x434xbf16> to vector<4x384xbf16>
    %7 = vector.extract_strided_slice %1 {offsets = [0, 26], sizes = [4, 384], strides = [1, 1]} : vector<4x434xbf16> to vector<4x384xbf16>
    %8 = vector.extract_strided_slice %1 {offsets = [0, 48], sizes = [4, 384], strides = [1, 1]} : vector<4x434xbf16> to vector<4x384xbf16>
    %9 = vector.extract_strided_slice %1 {offsets = [0, 49], sizes = [4, 384], strides = [1, 1]} : vector<4x434xbf16> to vector<4x384xbf16>
    %10 = vector.extract_strided_slice %1 {offsets = [0, 50], sizes = [4, 384], strides = [1, 1]} : vector<4x434xbf16> to vector<4x384xbf16>
    %11 = tpu.concatenate %2, %3, %4, %5, %6, %7, %8, %9, %10 in 0 : vector<4x384xbf16>, vector<4x384xbf16>, vector<4x384xbf16>, vector<4x384xbf16>, vector<4x384xbf16>, vector<4x384xbf16>, vector<4x384xbf16>, vector<4x384xbf16>, vector<4x384xbf16> -> vector<36x384xbf16>
    %c0_3 = arith.constant 0 : index
    %c0_4 = arith.constant 0 : index
    %12 = vector.load %arg3[%c0_3, %c0_4] : memref<16x36xbf16, #tpu.memory_space<vmem>>, vector<16x36xbf16>
    %cst = arith.constant dense<0.000000e+00> : vector<16x384xf32>
    %13 = tpu.matmul %12, %11, %cst {dimension_numbers = #tpu.dot_dimension_numbers<[1], [0], [0], [1], [0, 0, 1, 1], [], []>} : vector<16x36xbf16>, vector<36x384xbf16>, vector<16x384xf32> -> vector<16x384xf32>
    %c0_5 = arith.constant 0 : index
    %c0_6 = arith.constant 0 : index
    %14 = vector.load %arg4[%c0_5, %c0_6] : memref<16x1xf32, #tpu.memory_space<vmem>>, vector<16x1xf32>
    %15 = vector.broadcast %14 : vector<16x1xf32> to vector<16x384xf32>
    %16 = arith.addf %13, %15 : vector<16x384xf32>
    %17 = arith.negf %16 : vector<16x384xf32>
    %18 = math.exp %17 : vector<16x384xf32>
    %cst_7 = arith.constant 1.000000e+00 : f32
    %19 = vector.broadcast %cst_7 : f32 to vector<16x384xf32>
    %20 = arith.addf %19, %18 : vector<16x384xf32>
    %21 = arith.divf %19, %20 : vector<16x384xf32>
    %22 = arith.mulf %16, %21 : vector<16x384xf32>
    %c0_8 = arith.constant 0 : index
    %c0_9 = arith.constant 0 : index
    %23 = vector.load %arg5[%c0_8, %c0_9] : memref<4x16xbf16, #tpu.memory_space<vmem>>, vector<4x16xbf16>
    %24 = arith.truncf %22 : vector<16x384xf32> to vector<16x384xbf16>
    %cst_10 = arith.constant dense<0.000000e+00> : vector<4x384xf32>
    %25 = tpu.matmul %23, %24, %cst_10 {dimension_numbers = #tpu.dot_dimension_numbers<[1], [0], [0], [1], [0, 0, 1, 1], [], []>} : vector<4x16xbf16>, vector<16x384xbf16>, vector<4x384xf32> -> vector<4x384xf32>
    %c0_11 = arith.constant 0 : index
    %c0_12 = arith.constant 0 : index
    %26 = vector.load %arg6[%c0_11, %c0_12] : memref<4x1xf32, #tpu.memory_space<vmem>>, vector<4x1xf32>
    %27 = vector.broadcast %26 : vector<4x1xf32> to vector<4x384xf32>
    %28 = arith.addf %25, %27 : vector<4x384xf32>
    %29 = vector.extract_strided_slice %1 {offsets = [0, 25], sizes = [4, 384], strides = [1, 1]} : vector<4x434xbf16> to vector<4x384xbf16>
    %30 = arith.extf %29 : vector<4x384xbf16> to vector<4x384xf32>
    %31 = arith.addf %28, %30 : vector<4x384xf32>
    %c0_13 = arith.constant 0 : index
    %c0_14 = arith.constant 0 : index
    %c0_15 = arith.constant 0 : index
    %c0_16 = arith.constant 0 : index
    %32 = vector.load %arg7[%c0_13, %c0_14, %c0_15, %c0_16] : memref<1x1x4x384xf32, #tpu.memory_space<vmem>>, vector<1x1x4x384xf32>
    %33 = vector.shape_cast %32 : vector<1x1x4x384xf32> to vector<4x384xf32>
    %34 = vector.shape_cast %31 : vector<4x384xf32> to vector<1x1x4x384xf32>
    tpu.vector_store %arg7[%c0_13, %c0_14, %c0_15, %c0_16], %34 {strides = array<i32>} : memref<1x1x4x384xf32, #tpu.memory_space<vmem>>, vector<1x1x4x384xf32>,
    return
  }
  func.func @transform_0(%arg0: i32, %arg1: i32) -> (i32, i32, i32, i32) {
    %c0_i32 = arith.constant 0 : i32
    %c0_i32_0 = arith.constant 0 : i32
    %c0_i32_1 = arith.constant 0 : i32
    return %arg0, %arg1, %c0_i32, %c0_i32_0 : i32, i32, i32, i32
  }
  func.func @transform_1(%arg0: i32, %arg1: i32) -> (i32, i32) {
    %c0_i32 = arith.constant 0 : i32
    %c0_i32_0 = arith.constant 0 : i32
    %c0_i32_1 = arith.constant 0 : i32
    return %c0_i32, %c0_i32_0 : i32, i32
  }
  func.func @transform_2(%arg0: i32, %arg1: i32) -> (i32, i32) {
    %c0_i32 = arith.constant 0 : i32
    %c0_i32_0 = arith.constant 0 : i32
    %c0_i32_1 = arith.constant 0 : i32
    return %c0_i32, %c0_i32_0 : i32, i32
  }
  func.func @transform_3(%arg0: i32, %arg1: i32) -> (i32, i32) {
    %c0_i32 = arith.constant 0 : i32
    %c0_i32_0 = arith.constant 0 : i32
    %c0_i32_1 = arith.constant 0 : i32
    return %c0_i32, %c0_i32_0 : i32, i32
  }
  func.func @transform_4(%arg0: i32, %arg1: i32) -> (i32, i32) {
    %c0_i32 = arith.constant 0 : i32
    %c0_i32_0 = arith.constant 0 : i32
    %c0_i32_1 = arith.constant 0 : i32
    return %c0_i32, %c0_i32_0 : i32, i32
  }
  func.func @transform_5(%arg0: i32, %arg1: i32) -> (i32, i32, i32, i32) {
    %c0_i32 = arith.constant 0 : i32
    %c0_i32_0 = arith.constant 0 : i32
    %c0_i32_1 = arith.constant 0 : i32
    return %arg0, %arg1, %c0_i32, %c0_i32_0 : i32, i32, i32, i32
  }
}

</mosaic_0001>

<bundles_post_ra>
// kernel: fused_mbconv.1
= control target key start
LH: loop header
LB: loop body
LE: loop exit
PB: predicated region body
PF: predicated region fallthrough
CT: control target
= control target key end

     0   :  { %s997_s18 = smov 0   ;;  %s999_s19 = smov 0   ;;  %s1159_s0 = inlined_call_operand.vmem [shape: bf16[2,1,4,434], index: 0, kind: input, shape index: {}]   ;;  %s1160_s1 = inlined_call_operand.vmem [shape: bf16[16,36], index: 1, kind: input, shape index: {}]   ;;  %s1161_s2 = inlined_call_operand.vmem [shape: f32[16,1], index: 2, kind: input, shape index: {}]   ;;  %s1162_s3 = inlined_call_operand.vmem [shape: bf16[4,16], index: 3, kind: input, shape index: {}]   ;;  %s1163_s4 = inlined_call_operand.vmem [shape: f32[4,1], index: 4, kind: input, shape index: {}]   ;;  %s1164_s5 = inlined_call_operand.vmem [shape: f32[2,1,4,384], index: 5, kind: output, shape index: {}]  }
   0x1   :  { %s1001_s20 = smov 0  }
   0x2 LB: > { %s27_s21 = sadd.s32 1, %s949_s19  ;;  %p819_p0 = scmp.ge.s32.totalorder %s953_s20, 1  ;;  %s953_s20 = sphi %s1001_s20, %s15_s20   ;;  %s949_s19 = sphi %s999_s19, %s1166_s19   ;;  %s945_s18 = sphi %s997_s18, %s1165_s18  }
   0x3   : > { %p29_p1 = scmp.ge.s32.totalorder %s27_s21, 2  ;;  %p207_p2 = scmp.lt.s32.totalorder %s953_s20, 3 }
   0x5   : > { %s1168_s21 = smov (%p29_p1, %s27_s21), 0  ;;  %p208_p3 = pnand %p819_p0, %p207_p2 }
   0x6   : > { %p243_p4 = scmp.lt.s32.totalorder (!%p208_p3), %s945_s18, 1  ;;  %v268_v0 = vlaneseq (!%p208_p3)  ;;  %v955_v1 = vmov (!%p208_p3), 1983009808   ;;  %s956_s26 = smov (!%p208_p3), 126   ;;  %v962_v17 = vmov (!%p208_p3), 0.0   ;;  %v964_v19 = vmov (!%p208_p3), 0  }
   0x7   : > { %211 = sbr.rel (%p208_p3) target bundleno = 670 (0x29e), region = 40  ;;  %v266_v2 = vunpack.c.l.s4 (!%p208_p3), %v955_v1  ;;  %s957_s27 = smov (!%p208_p3), 127   ;;  %844 = vmatprep.subr.bf16.mxu1 (!%p208_p3), %v962_v17  ;;  %504 = vmatprep.mubr.bf16.mxu0 (!%p208_p3), %v964_v19  ;;  %vm966_vm0 = vmmov (!%p208_p3), 0   ;;  %v442_v20 = vld [vmem:[%s1161_s2] sm:$0xff] (!%p208_p3)  ;;  %v443_v21 = vld [vmem:[%s1161_s2 + $0x8] sm:$0xff] (!%p208_p3)  ;;  %vm297_vm1 = vcmask (!%p208_p3), 1039360  }
   0x8   : > { %v269_v3 = vshrl.u32 (!%p208_p3), %v268_v0, 7  ;;  %s958_s28 = smov (!%p208_p3), 104   ;;  %s959_s29 = smov (!%p208_p3), 103   ;;  %897 = vset.pattern.permute.xlu0 (!%p208_p3), %v964_v19  ;;  %898 = vset.pattern.permute.xlu1 (!%p208_p3), %v964_v19  ;;  %v602_v22 = vld [vmem:[%s1163_s4] sm:$0xf] (!%p208_p3)  ;;  %vm389_vm2 = vcmask (!%p208_p3), 1041408  }
   0x9   : > { %v267_v4 = vunpack.c.0.s8 (!%p208_p3), %v266_v2  ;;  %s960_s30 = smov (!%p208_p3), 102   ;;  %s961_s6 = smov (!%p208_p3), 80   ;;  %850 = vmatprep.mubr.msk.bf16.mxu1 (!%p208_p3), %vm966_vm0, %v962_v17  ;;  %vm324_vm3 = vcmask (!%p208_p3), 850944   ;;  %vm311_vm4 = vcmask (!%p208_p3), 1031168   ;;  %vm406_vm5 = vcmask (!%p208_p3), 1045504  }
   0xa   : > { %s963_s7 = smov (!%p208_p3), 79   ;;  %s965_s8 = smov (!%p208_p3), 78   ;;  %vm399_vm6 = vcmask (!%p208_p3), 1043456   ;;  %vm349_vm7 = vcmask (!%p208_p3), 834560   ;;  %vm361_vm8 = vcmask (!%p208_p3), 654336   ;;  %vm337_vm9 = vcmask (!%p208_p3), 842752  }
   0xb   : > { %v270_v5 = vsub.s32 (!%p208_p3), %v267_v4, %v269_v3  ;;  %vm373_vm10 = vcmask (!%p208_p3), 646144   ;;  %vm385_vm11 = vcmask (!%p208_p3), 637952   ;;  %vm459_vm12 = vcmask (!%p208_p3), 293888  }
   0xc   : > { %vm608_vm13 = vcmask (!%p208_p3), 130048  }
   0xe   : > { %s1170_s18 = smov (!%p243_p4, %s945_s18), 1 }
   0xf   : > { %s837_s22 = sshll.u32 %s1170_s18, 3  ;;  %s860_s23 = smul.u32 12, %s1170_s18 }
  0x10   : > { %s251_s25 = scalar_lea.vmem %s1159_s0, %s837_s22 }
  0x11   : > { %v1021_v6 = vld [vmem:[%s251_s25] sm:$0xff] }
  0x12   : > { %v1024_v7 = vrot.slane %v1021_v6, %v270_v5  ;;  %v280_v8 = vcombine.low %v1021_v6, %v1021_v6  ;;  %v264_v10 = vcombine.high %v1021_v6, %v1021_v6 }
  0x14   : > { %305 = vrot.lane.b32.xlu1 %v1024_v7, %s956_s26  ;;  %293 = vrot.lane.b32.xlu0 %v1024_v7, %s957_s27  ;;  %v287_v9 = vrot.slane %v280_v8, %v270_v5  ;;  %v301_v12 = vcombine.low %v1024_v7, %v1024_v7  ;;  %v1036_v13 = vrot.slane %v264_v10, %v270_v5 }
  0x15   : > { %v279_v15 = vcombine.high %v1024_v7, %v1024_v7 }
  0x16   : > { %v288_v11 = vcombine.high %v287_v9, %v287_v9  ;;  %v302_v14 = vcombine.low %v1036_v13, %v1036_v13  ;;  %v315_v16 = vcombine.low %v287_v9, %v287_v9  ;;  %v328_v18 = vcombine.high %v1036_v13, %v1036_v13 }
  0x18   : > { %289 = vrot.lane.b32.xlu1 %v287_v9, %s957_s27  ;;  %318 = vrot.lane.b32.xlu0 %v287_v9, %s958_s28 }
  0x1c   : > { %291 = vrot.lane.b32.xlu0 %v288_v11, %s957_s27  ;;  %303 = vrot.lane.b32.xlu1 %v301_v12, %s956_s26 }
  0x20   : > { %320 = vrot.lane.b32.xlu1 %v301_v12, %s958_s28  ;;  %307 = vrot.lane.b32.xlu0 %v302_v14, %s956_s26 }
  0x24   : > { %331 = vrot.lane.b32.xlu1 %v279_v15, %s959_s29  ;;  %316 = vrot.lane.b32.xlu0 %v315_v16, %s958_s28 }
  0x28   : > { %343 = vrot.lane.b32.xlu1 %v288_v11, %s960_s30  ;;  %333 = vrot.lane.b32.xlu0 %v1036_v13, %s959_s29 }
  0x2c   : > { %329 = vrot.lane.b32.xlu1 %v1024_v7, %s959_s29  ;;  %345 = vrot.lane.b32.xlu0 %v1024_v7, %s960_s30 }
  0x30   : > { %355 = vrot.lane.b32.xlu1 %v1024_v7, %s961_s6  ;;  %341 = vrot.lane.b32.xlu0 %v287_v9, %s960_s30 }
  0x34   : > { %295 = vrot.lane.b32.xlu1 %v279_v15, %s957_s27  ;;  %357 = vrot.lane.b32.xlu0 %v302_v14, %s961_s6 }
  0x38   : > { %367 = vrot.lane.b32.xlu1 %v287_v9, %s963_s7  ;;  %353 = vrot.lane.b32.xlu0 %v301_v12, %s961_s6 }
  0x3c   : > { %309 = vrot.lane.b32.xlu1 %v1036_v13, %s956_s26  ;;  %369 = vrot.lane.b32.xlu0 %v301_v12, %s963_s7  ;;  %s260_s26 = scalar_lea.vmem %s1164_s5, %s860_s23 }
  0x40   : > { %322 = vrot.lane.b32.xlu1 %v1024_v7, %s958_s28  ;;  %365 = vrot.lane.b32.xlu0 %v315_v16, %s963_s7 }
  0x44   : > { %347 = vrot.lane.b32.xlu1 %v279_v15, %s960_s30  ;;  %335 = vrot.lane.b32.xlu0 %v328_v18, %s959_s29 }
  0x48   : > { %377 = vrot.lane.b32.xlu1 %v1024_v7, %s965_s8  ;;  %359 = vrot.lane.b32.xlu0 %v1036_v13, %s961_s6 }
  0x4c   : > { %381 = vrot.lane.b32.xlu1 %v1036_v13, %s965_s8  ;;  %379 = vrot.lane.b32.xlu0 %v279_v15, %s965_s8 }
  0x50   : > { %383 = vrot.lane.b32.xlu1 %v328_v18, %s965_s8  ;;  %371 = vrot.lane.b32.xlu0 %v1024_v7, %s963_s7 }
  0x54   : > { %446 = vperm.xlu0 %897, %v442_v20   ;;  %451 = vperm.xlu1 %898, %v443_v21  }
  0x58   : > { %605 = vperm.xlu1 %898, %v602_v22  }
  0x86   : > { %v306_v23 = vpop.permute.xlu1 %305  ;;  %v294_v24 = vpop.permute.xlu0 %293 }
  0x8a   : > { %v290_v25 = vpop.permute.xlu1 %289  ;;  %v319_v26 = vpop.permute.xlu0 %318 }
  0x8e   : > { %v292_v27 = vpop.permute.xlu0 %291  ;;  %v304_v28 = vpop.permute.xlu1 %303 }
  0x8f   : > { %v299_v29 = vsel %vm297_vm1, %v292_v27, %v294_v24  ;;  %v298_v30 = vsel %vm297_vm1, %v290_v25, %v292_v27  ;;  %v312_v37 = vsel %vm311_vm4, %v304_v28, %v306_v23 }
  0x90   : > { %v395_v33 = vsel %vm389_vm2, %v279_v15, %v299_v29  ;;  %v392_v36 = vsel %vm389_vm2, %v1024_v7, %v298_v30  ;;  %v906_v30 = vld [vmem:[%s1160_s1] sm:$0xff]  }
  0x91   : > { %v401_v43 = vsel %vm399_vm6, %v392_v36, %v312_v37 }
  0x92   : > { %v321_v31 = vpop.permute.xlu1 %320  ;;  %v308_v32 = vpop.permute.xlu0 %307 }
  0x93   : > { %v326_v34 = vsel %vm324_vm3, %v319_v26, %v321_v31  ;;  %v313_v35 = vsel %vm311_vm4, %v306_v23, %v308_v32 }
  0x94   : > { %v403_v38 = vsel %vm399_vm6, %v395_v33, %v313_v35 }
  0x95   : > { %v411_v39 = vsel %vm406_vm5, %v403_v38, %v326_v34 }
  0x96   : > { %v332_v40 = vpop.permute.xlu1 %331  ;;  %472 = vmatprep.subr.bf16.mxu0 %v411_v39  ;;  %v317_v41 = vpop.permute.xlu0 %316  ;;  %v693_v39 = vunpack.c.l.bf16 %v1021_v6 }
  0x97   : > { %v325_v42 = vsel %vm324_vm3, %v317_v41, %v319_v26 }
  0x98   : > { %v408_v44 = vsel %vm406_vm5, %v401_v43, %v325_v42  ;;  %v697_v41 = vcombine.high %v693_v39, %v693_v39 }
  0x99   : > { %473 = vmatpush1.bf16.msra.mxu0 %v408_v44 }
  0x9a   : > { %v344_v45 = vpop.permute.xlu1 %343  ;;  %v334_v46 = vpop.permute.xlu0 %333  ;;  %v899_v42 = vpack.i.bf16 %v697_v41, %v693_v39 }
  0x9b   : > { %v339_v57 = vsel %vm337_vm9, %v332_v40, %v334_v46 }
  0x9c   : > { %900 = vrot.lane.b32.xlu0 %v899_v42, %s959_s29 }
  0x9e   : > { %v330_v47 = vpop.permute.xlu1 %329  ;;  %v346_v48 = vpop.permute.xlu0 %345 }
  0x9f   : > { %v351_v55 = vsel %vm349_vm7, %v344_v45, %v346_v48  ;;  %v338_v4 = vsel %vm337_vm9, %v330_v47, %v332_v40  ;;  %v694_v40 = vunpack.c.h.bf16 %v1021_v6 }
  0xa0   : > { %v421_v58 = vsel %vm389_vm2, %v339_v57, %v351_v55 }
  0xa1   : > { %703 = vrot.lane.b32.xlu1 %v694_v40, %s959_s29 }
  0xa2   : > { %v356_v49 = vpop.permute.xlu1 %355  ;;  %v342_v50 = vpop.permute.xlu0 %341 }
  0xa3   : > { %v350_v61 = vsel %vm349_vm7, %v342_v50, %v344_v45 }
  0xa4   : > { %v418_v5 = vsel %vm389_vm2, %v338_v4, %v350_v61 }
  0xa6   : > { %v296_v51 = vpop.permute.xlu1 %295  ;;  %v358_v52 = vpop.permute.xlu0 %357 }
  0xa7   : > { %v363_v56 = vsel %vm361_vm8, %v356_v49, %v358_v52  ;;  %v300_v62 = vsel %vm297_vm1, %v294_v24, %v296_v51 }
  0xa8   : > { %v428_v0 = vsel %vm399_vm6, %v421_v58, %v363_v56  ;;  %v398_v7 = vsel %vm389_vm2, %v1036_v13, %v300_v62 }
  0xaa   : > { %v368_v53 = vpop.permute.xlu1 %367  ;;  %v354_v54 = vpop.permute.xlu0 %353 }
  0xab   : > { %v362_v1 = vsel %vm361_vm8, %v354_v54, %v356_v49 }
  0xac   : > { %v426_v12 = vsel %vm399_vm6, %v418_v5, %v362_v1 }
  0xae   : > { %v310_v59 = vpop.permute.xlu1 %309  ;;  %v370_v60 = vpop.permute.xlu0 %369 }
  0xaf   : > { %v375_v63 = vsel %vm373_vm10, %v368_v53, %v370_v60  ;;  %v314_v2 = vsel %vm311_vm4, %v308_v32, %v310_v59 }
  0xb0   : > { %v435_v3 = vsel %vm406_vm5, %v428_v0, %v375_v63  ;;  %v405_v14 = vsel %vm399_vm6, %v398_v7, %v314_v2 }
  0xb1   : > { %474 = vmatprep.subr.bf16.mxu0 %v435_v3 }
  0xb2   : > { %v323_v8 = vpop.permute.xlu1 %322  ;;  %v366_v9 = vpop.permute.xlu0 %365 }
  0xb3   : > { %v327_v10 = vsel %vm324_vm3, %v321_v31, %v323_v8  ;;  %v374_v11 = vsel %vm373_vm10, %v366_v9, %v368_v53 }
  0xb4   : > { %v432_v15 = vsel %vm406_vm5, %v426_v12, %v374_v11  ;;  %v414_v16 = vsel %vm406_vm5, %v405_v14, %v327_v10 }
  0xb5   : > { %475 = vmatpush1.bf16.msra.mxu0 %v432_v15  ;;  %845 = vmatpush3.bf16.msra.mxu1 %v414_v16 }
  0xb6   : > { %v348_v18 = vpop.permute.xlu1 %347  ;;  %v336_v20 = vpop.permute.xlu0 %335  ;;  %846 = vmatprep.subr.bf16.mxu1 %v962_v17 }
  0xb7   : > { %v352_v24 = vsel %vm349_vm7, %v346_v48, %v348_v18  ;;  %v340_v25 = vsel %vm337_vm9, %v334_v46, %v336_v20 }
  0xb8   : > { %v424_v31 = vsel %vm389_vm2, %v340_v25, %v352_v24  ;;  %v598_v25 = vld [vmem:[%s1162_s3] sm:$0x3] }
  0xba   : > { %v378_v13 = vpop.permute.xlu1 %377  ;;  %v360_v21 = vpop.permute.xlu0 %359 }
  0xbb   : > { %v364_v28 = vsel %vm361_vm8, %v358_v52, %v360_v21 }
  0xbc   : > { %v430_v35 = vsel %vm399_vm6, %v424_v31, %v364_v28 }
  0xbe   : > { %v382_v22 = vpop.permute.xlu1 %381  ;;  %v380_v23 = vpop.permute.xlu0 %379 }
  0xbf   : > { %v386_v26 = vsel %vm385_vm11, %v378_v13, %v380_v23  ;;  %v387_v27 = vsel %vm385_vm11, %v380_v23, %v382_v22 }
  0xc0   : > { %824 = vmatprep.subr.msk.bf16.mxu0 %vm389_vm2, %v387_v27  ;;  %v464_v29 = vsel %vm389_vm2, %v386_v26, 0 }
  0xc1   : > { %477 = vmatpush1.bf16.msra.mxu0 %v464_v29 }
  0xc2   : > { %v384_v32 = vpop.permute.xlu1 %383  ;;  %v372_v33 = vpop.permute.xlu0 %371 }
  0xc3   : > { %v376_v34 = vsel %vm373_vm10, %v370_v60, %v372_v33  ;;  %v388_v37 = vsel %vm385_vm11, %v382_v22, %v384_v32 }
  0xc4   : > { %825 = vmatmul.mubr.msk.bf16.vlgmr.msra.gmra.mrb[0].mxu0 %vm459_vm12, %v906_v30  ;;  %v438_v36 = vsel %vm406_vm5, %v430_v35, %v376_v34  ;;  %v470_v38 = vsel %vm389_vm2, %v388_v37, 0 }
  0xc5   : > { %847 = vmatpush3.bf16.msra.mxu1 %v438_v36  ;;  %644 = vmatprep.mubr.bf16.mxu0 %v964_v19  ;;  %v698_v19 = vcombine.high %v694_v40, %v694_v40 }
  0xc6   : > { %848 = vmatprep.subr.bf16.mxu1 %v962_v17 }
  0xc7   : > { %705 = vrot.lane.b32.xlu0 %v698_v19, %s959_s29 }
  0xc9   : > { %849 = vmatpush3.bf16.msra.mxu1 %v470_v38 }
  0xca   : > { %854 = vmatprep.subr.bf16.mxu1 %v962_v17 }
  0xcc   : > { %851 = vmatmul.mubr.msk.bf16.vlgmr.msra.gmra.mrb[0].mxu1 %vm459_vm12, %v906_v30 }
  0xcd   : > { %856 = vmatprep.mubr.msk.bf16.mxu1 %vm966_vm0, %v962_v17 }
  0xd3   : > { %v447_v43 = vpop.permute.xlu0 %446  ;;  %v452_v45 = vpop.permute.xlu1 %451 }
  0xd7   : > { %v606_v31 = vpop.permute.xlu1 %605 }
 0x10e   : > { %v901_v30 = vpop.permute.xlu0 %900 }
 0x10f   : > { %v903_v32 = vunpack.i.h.bf16 %v901_v30  ;;  %v902_v33 = vunpack.i.l.bf16 %v901_v30 }
 0x111   : > { %v708_v36 = vsel %vm337_vm9, %v902_v33, %v903_v32 }
 0x113   : > { %v704_v34 = vpop.permute.xlu1 %703 }
 0x114   : > { %v709_v39 = vsel %vm337_vm9, %v903_v32, %v704_v34 }
 0x197   : > { %v506_v44 = vpop.f32.mrb[0].mxu0 }
 0x198   : > { %v507_v46 = vadd.f32 %v506_v44, %v447_v43  ;;  %v508_v47 = vpop.f32.mrb[1].mxu0  ;;  %v706_v44 = vpop.permute.xlu0 %705 }
 0x199   : > { %v509_v48 = vadd.f32 %v508_v47, %v447_v43  ;;  %v510_v17 = vpop.f32.mrb[2].mxu0 }
 0x19a   : > { %v827_v49 = vmul.f32 -1.442695, %v507_v46  ;;  %v511_v50 = vadd.f32 %v510_v17, %v452_v45  ;;  %v512_v51 = vpop.f32.mrb[3].mxu0  ;;  %v710_v17 = vsel %vm337_vm9, %v704_v34, %v706_v44 }
 0x19b   : > { %v828_v6 = vmul.f32 -1.442695, %v509_v48  ;;  %v513_v52 = vadd.f32 %v512_v51, %v452_v45 }
 0x19c   : > { %907 = vpow2.f32 %v827_v49  ;;  %v830_v53 = vmul.f32 -1.442695, %v511_v50 }
 0x19d   : > { %909 = vpow2.f32 %v828_v6  ;;  %v831_v54 = vmul.f32 -1.442695, %v513_v52 }
 0x19e   : > { %911 = vpow2.f32 %v830_v53 }
 0x19f   : > { %913 = vpow2.f32 %v831_v54  ;;  %v549_v55 = vpop.f32.mrb[0].mxu1 }
 0x1a0   : > { %v550_v56 = vadd.f32 %v549_v55, %v447_v43  ;;  %v852_v57 = vpop.f32.mrb[1].mxu1 }
 0x1a1   : > { %v552_v58 = vpop.f32.mrb[2].mxu1 }
 0x1a2   : > { %v829_v59 = vmul.f32 -1.442695, %v550_v56  ;;  %v553_v60 = vadd.f32 %v552_v58, %v452_v45  ;;  %v853_v61 = vpop.f32.mrb[3].mxu1 }
 0x1a4   : > { %915 = vpow2.f32 %v829_v59  ;;  %v832_v62 = vmul.f32 -1.442695, %v553_v60 }
 0x1a6   : > { %v908_v63 = vpop.eup %907  ;;  %917 = vpow2.f32 %v832_v62 }
 0x1a7   : > { %v910_v0 = vpop.eup %909  ;;  %v574_v1 = vadd.f32 1.0, %v908_v63 }
 0x1a8   : > { %v912_v2 = vpop.eup %911  ;;  %v575_v3 = vadd.f32 1.0, %v910_v0 }
 0x1a9   : > { %v914_v4 = vpop.eup %913  ;;  %919 = vrcp.f32 %v574_v1  ;;  %v577_v5 = vadd.f32 1.0, %v912_v2 }
 0x1aa   : > { %921 = vrcp.f32 %v575_v3  ;;  %v578_v7 = vadd.f32 1.0, %v914_v4 }
 0x1ab   : > { %923 = vrcp.f32 %v577_v5 }
 0x1ac   : > { %925 = vrcp.f32 %v578_v7 }
 0x1ae   : > { %v916_v8 = vpop.eup %915 }
 0x1af   : > { %v576_v9 = vadd.f32 1.0, %v916_v8 }
 0x1b0   : > { %v918_v10 = vpop.eup %917 }
 0x1b1   : > { %927 = vrcp.f32 %v576_v9  ;;  %v579_v11 = vadd.f32 1.0, %v918_v10 }
 0x1b3   : > { %v920_v12 = vpop.eup %919  ;;  %929 = vrcp.f32 %v579_v11 }
 0x1b4   : > { %v922_v14 = vpop.eup %921  ;;  %v592_v18 = vmul.f32 %v920_v12, %v507_v46 }
 0x1b5   : > { %v924_v15 = vpop.eup %923  ;;  %v593_v13 = vmul.f32 %v922_v14, %v509_v48 }
 0x1b6   : > { %v926_v16 = vpop.eup %925  ;;  %v595_v20 = vmul.f32 %v924_v15, %v511_v50 }
 0x1b7   : > { %v596_v21 = vmul.f32 %v926_v16, %v513_v52 }
 0x1b8   : > { %v599_v22 = vpack.c.bf16 %v595_v20, %v592_v18 }
 0x1b9   : > { %v600_v23 = vpack.c.bf16 %v596_v21, %v593_v13 }
 0x1bb   : > { %v928_v24 = vpop.eup %927  ;;  %612 = vmatprep.subr.bf16.mxu0 %v600_v23 }
 0x1bc   : > { %613 = vmatpush1.bf16.msra.mxu0 %v599_v22  ;;  %v594_v27 = vmul.f32 %v928_v24, %v550_v56 }
 0x1bd   : > { %v930_v26 = vpop.eup %929 }
 0x1be   : > { %v597_v28 = vmul.f32 %v930_v26, %v553_v60 }
 0x1bf   : > { %833 = vmatmul.mubr.msk.bf16.vlgmr.msra.gmra.mrb[4].mxu0 %vm608_vm13, %v598_v25 }
 0x1c0   : > { %v601_v29 = vpack.c.bf16 %v597_v28, %v594_v27 }
 0x1c2   : > { %855 = vmatpush3.bf16.msra.mxu1 %v601_v29 }
 0x1c5   : > { %857 = vmatmul.mubr.msk.bf16.vlgmr.msra.gmra.mrb[4].mxu1 %vm608_vm13, %v598_v25 }
 0x292   : > { %v646_v35 = vpop.f32.mrb[4].mxu0 }
 0x293   : > { %v647_v37 = vadd.f32 %v646_v35, %v606_v31  ;;  %v648_v38 = vpop.f32.mrb[5].mxu0 }
 0x294   : > { %v649_v40 = vadd.f32 %v648_v38, %v606_v31  ;;  %v650_v41 = vpop.f32.mrb[6].mxu0 }
 0x295   : > { %v714_v42 = vadd.f32 %v708_v36, %v647_v37  ;;  %v651_v19 = vpop.f32.mrb[7].mxu0 }
 0x296   : > { %v715_v43 = vadd.f32 %v709_v39, %v649_v40 }
 0x298   : > { %v719_v45 = vcombine.low %v714_v42, %v715_v43  ;;  %v687_v46 = vpop.f32.mrb[4].mxu1 }
 0x299   : > { %v688_v47 = vadd.f32 %v687_v46, %v606_v31  ;;  %v858_v48 = vpop.f32.mrb[5].mxu1 }
 0x29a   : > { %721 = vst [vmem:[%s260_s26] sm:$0xff] %v719_v45  ;;  %v690_v49 = vpop.f32.mrb[6].mxu1 }
 0x29b   : > { %v716_v50 = vadd.f32 %v710_v17, %v688_v47  ;;  %v859_v51 = vpop.f32.mrb[7].mxu1 }
 0x29d   : > { %722 = vst [vmem:[%s260_s26 + $0x8] sm:$0xf] %v716_v50 }
 0x29e PF: > { %s15_s20 = sadd.s32 1, %s953_s20   ;;  %s1165_s18 = smov %s949_s19 }
 0x29f   : > { %p12_p5 = scmp.ge.s32.totalorder %s15_s20, 4   ;;  %s1166_s19 = smov %s1168_s21 }
 0x2a1   :  { %14 = sbr.rel (!%p12_p5) target bundleno = 2 (0x2), region = 70 }

</bundles_post_ra>
